<compile_context>
chip_gen: v7x
topology: tpu7x:2x2x1
jax: 0.10.0
libtpu: 0.0.40
codegen_flags: <defaults>
</compile_context>

<pallas_src>
import functools

import jax
import jax.numpy as jnp
from jax.experimental import pallas as pl
from jax.experimental.pallas import tpu as pltpu

LANE = 128
_VMEM_BUDGET = 20 * 1024 * 1024   # target footprint for dbl-buffered blocks
_VMEM_LIMIT = 32 * 1024 * 1024    # explicit scoped-VMEM limit (>= v5e default 16 MiB)


def _ce2d_kernel(x_ref, t_ref, o_ref, *, hw, rows_per_block, n_row_tiles, needs_mask):
    """One grid step = one (batch, pixel-tile): stable log-sum-exp over the leading
    channel axis, one-hot target select, optional ragged-tail mask, then a single
    reduce of the tile to a (1, 128) per-lane partial sum written to this step's
    private output block."""
    x = x_ref[...].astype(jnp.float32)          # (C, ts, 128) logits
    t = t_ref[...]                              # (ts, 128) int32 class indices
    c = x.shape[0]

    # Numerically stable log-sum-exp over channels (leading, non-vreg axis -> pure VPU).
    m = jnp.max(x, axis=0)                      # (ts, 128)
    s = jnp.sum(jnp.exp(x - m[None]), axis=0)   # (ts, 128)
    lse = m + jnp.log(s)

    # x[target] via one-hot select-sum.  Small C: scalar-immediate compares per channel
    # (no per-step iota materialization); large C: single iota compare.
    if c <= 16:
        x_t = jnp.where(t == 0, x[0], 0.0)
        for cc in range(1, c):
            x_t = x_t + jnp.where(t == cc, x[cc], 0.0)
    else:
        cls = jax.lax.broadcasted_iota(jnp.int32, x.shape, 0)
        x_t = jnp.sum(jnp.where(cls == t[None], x, 0.0), axis=0)

    loss = lse - x_t                            # (ts, 128) = -log p[target]
    # TODO(synk): nn.NLLLoss ignore_index (-100) / per-class weight not handled
    # (spec constructs the module with weight=None and in-range targets).

    def _write(val):
        # Single cross-sublane reduce per tile -> (1, 128) per-lane partial.
        o_ref[...] = jnp.sum(val, axis=0, keepdims=True)

    if needs_mask:
        j = pl.program_id(1)
        last = n_row_tiles - 1

        @pl.when(j == last)
        def _():
            r = jax.lax.broadcasted_iota(jnp.int32, loss.shape, 0)
            l = jax.lax.broadcasted_iota(jnp.int32, loss.shape, 1)
            pix = (last * rows_per_block + r) * LANE + l
            _write(jnp.where(pix < hw, loss, 0.0))

        @pl.when(j != last)
        def _():
            _write(loss)
    else:
        _write(loss)


def _choose_rows_per_block(rows, c, logit_itemsize):
    """Rows (of 128 pixels each) per block: largest multiple of 16 whose real,
    padding-free footprint (double-buffered logits + double-buffered int32 targets)
    fits the VMEM budget, capped at the full extent."""
    per_row = LANE * (2 * c * logit_itemsize + 2 * 4)
    ts = max((_VMEM_BUDGET // per_row) // 16 * 16, 16)
    if ts >= rows:
        return rows            # full extent -> always a legal block shape
    return ts                  # multiple of 16 -> dense f32 and bf16 vreg packing


def cross_entropy_loss_2d(logits, targets):
    """logits: (N, C, H, W) float32/bfloat16; targets: (N, H, W) integer class idx."""
    n, c, h, w = logits.shape
    hw = h * w
    hw_pad = ((hw + LANE - 1) // LANE) * LANE

    x = logits.reshape(n, c, hw)
    t = targets.reshape(n, hw).astype(jnp.int32)
    if hw_pad != hw:
        # TODO(synk): one extra HBM copy only when H*W is not a multiple of 128.
        x = jnp.pad(x, ((0, 0), (0, 0), (0, hw_pad - hw)))
        t = jnp.pad(t, ((0, 0), (0, hw_pad - hw)))

    rows = hw_pad // LANE
    x = x.reshape(n, c, rows, LANE)     # pixels folded onto (sublane, lane): dense vregs
    t = t.reshape(n, rows, LANE)

    ts = _choose_rows_per_block(rows, c, jnp.dtype(logits.dtype).itemsize)
    n_tiles = pl.cdiv(rows, ts)
    needs_mask = hw < n_tiles * ts * LANE

    kernel = functools.partial(
        _ce2d_kernel, hw=hw, rows_per_block=ts, n_row_tiles=n_tiles,
        needs_mask=needs_mask)

    partials = pl.pallas_call(
        kernel,
        out_shape=jax.ShapeDtypeStruct((n, n_tiles, 1, LANE), jnp.float32),
        grid_spec=pltpu.PrefetchScalarGridSpec(
            num_scalar_prefetch=0,
            grid=(n, n_tiles),
            in_specs=[
                pl.BlockSpec((None, c, ts, LANE), lambda i, j: (i, 0, j, 0)),
                pl.BlockSpec((None, ts, LANE), lambda i, j: (i, j, 0)),
            ],
            out_specs=pl.BlockSpec((None, None, 1, LANE), lambda i, j: (i, j, 0, 0)),
        ),
        compiler_params=pltpu.CompilerParams(
            # Every grid step owns its output block -> fully parallel (v7x 2-TC safe).
            dimension_semantics=("parallel", "parallel"),
            vmem_limit_bytes=_VMEM_LIMIT,
        ),
    )(x, t)

    # Final tiny reduction + mean over N*H*W pixels.
    return jnp.sum(partials) / float(n * hw)


def cross_entropy_loss_2d_ref(logits, targets):
    """Pure-JAX reference mirroring nn.NLLLoss()(nn.LogSoftmax(dim=1)(x), t)."""
    logp = jax.nn.log_softmax(logits.astype(jnp.float32), axis=1)
    nll = -jnp.take_along_axis(logp, targets[:, None, :, :].astype(jnp.int32), axis=1)
    return jnp.mean(nll)


if __name__ == "__main__":
    key = jax.random.PRNGKey(0)
    k1, k2 = jax.random.split(key)
    N, C, H, W = 2, 4, 16, 16
    logits = jax.random.normal(k1, (N, C, H, W), dtype=jnp.float32)
    targets = jax.random.randint(k2, (N, H, W), 0, C, dtype=jnp.int32)

    loss = cross_entropy_loss_2d(logits, targets)
    jax.block_until_ready(loss)

    ref = cross_entropy_loss_2d_ref(logits, targets)
    assert jnp.allclose(loss, ref, atol=1e-5, rtol=1e-5), (loss, ref)
    print("KERNEL_OK")
</pallas_src>

<mosaic_0001>
module attributes {stable_mosaic.version = 11 : i64} {
  func.func @_ce2d_kernel(%arg0: i32, %arg1: i32, %arg2: memref<1x4x2x128xf32, #tpu.memory_space<vmem>>, %arg3: memref<1x2x128xi32, #tpu.memory_space<vmem>>, %arg4: memref<1x1x1x128xf32, #tpu.memory_space<vmem>>) attributes {dimension_semantics = [#tpu.dimension_semantics<parallel>, #tpu.dimension_semantics<parallel>], iteration_bounds = array<i64: 2, 1>, scalar_prefetch = 0 : i64, scratch_operands = 0 : i64, tpu.core_type = #tpu.core_type<tc>, window_params = [{transform_indices = @transform_0, window_bounds = array<i64: 1, 4, 2, 128>}, {transform_indices = @transform_1, window_bounds = array<i64: 1, 2, 128>}, {transform_indices = @transform_2, window_bounds = array<i64: 1, 1, 1, 128>}]} {
    %c0 = arith.constant 0 : index
    %c0_0 = arith.constant 0 : index
    %c0_1 = arith.constant 0 : index
    %c0_2 = arith.constant 0 : index
    %0 = vector.load %arg2[%c0, %c0_0, %c0_1, %c0_2] : memref<1x4x2x128xf32, #tpu.memory_space<vmem>>, vector<1x4x2x128xf32>
    %1 = vector.shape_cast %0 : vector<1x4x2x128xf32> to vector<4x2x128xf32>
    %c0_3 = arith.constant 0 : index
    %c0_4 = arith.constant 0 : index
    %c0_5 = arith.constant 0 : index
    %2 = vector.load %arg3[%c0_3, %c0_4, %c0_5] : memref<1x2x128xi32, #tpu.memory_space<vmem>>, vector<1x2x128xi32>
    %3 = vector.shape_cast %2 : vector<1x2x128xi32> to vector<2x128xi32>
    %cst = arith.constant dense<0xFF800000> : vector<2x128xf32>
    %4 = vector.multi_reduction <maximumf>, %1, %cst [0] : vector<4x2x128xf32> to vector<2x128xf32>
    %5 = vector.shape_cast %4 : vector<2x128xf32> to vector<1x2x128xf32>
    %6 = vector.broadcast %5 : vector<1x2x128xf32> to vector<4x2x128xf32>
    %7 = arith.subf %1, %6 : vector<4x2x128xf32>
    %8 = math.exp %7 : vector<4x2x128xf32>
    %cst_6 = arith.constant dense<0.000000e+00> : vector<2x128xf32>
    %9 = vector.multi_reduction <add>, %8, %cst_6 [0] : vector<4x2x128xf32> to vector<2x128xf32>
    %10 = math.log %9 : vector<2x128xf32>
    %11 = arith.addf %4, %10 : vector<2x128xf32>
    %c0_i32 = arith.constant 0 : i32
    %12 = vector.broadcast %c0_i32 : i32 to vector<2x128xi32>
    %13 = arith.cmpi eq, %3, %12 : vector<2x128xi32>
    %14 = vector.extract_strided_slice %1 {offsets = [0, 0, 0], sizes = [1, 2, 128], strides = [1, 1, 1]} : vector<4x2x128xf32> to vector<1x2x128xf32>
    %15 = vector.shape_cast %14 : vector<1x2x128xf32> to vector<2x128xf32>
    %cst_7 = arith.constant 0.000000e+00 : f32
    %16 = vector.broadcast %cst_7 : f32 to vector<2x128xf32>
    %17 = arith.select %13, %15, %16 : vector<2x128xi1>, vector<2x128xf32>
    %c1_i32 = arith.constant 1 : i32
    %18 = vector.broadcast %c1_i32 : i32 to vector<2x128xi32>
    %19 = arith.cmpi eq, %3, %18 : vector<2x128xi32>
    %20 = vector.extract_strided_slice %1 {offsets = [1, 0, 0], sizes = [1, 2, 128], strides = [1, 1, 1]} : vector<4x2x128xf32> to vector<1x2x128xf32>
    %21 = vector.shape_cast %20 : vector<1x2x128xf32> to vector<2x128xf32>
    %cst_8 = arith.constant 0.000000e+00 : f32
    %22 = vector.broadcast %cst_8 : f32 to vector<2x128xf32>
    %23 = arith.select %19, %21, %22 : vector<2x128xi1>, vector<2x128xf32>
    %24 = arith.addf %17, %23 : vector<2x128xf32>
    %c2_i32 = arith.constant 2 : i32
    %25 = vector.broadcast %c2_i32 : i32 to vector<2x128xi32>
    %26 = arith.cmpi eq, %3, %25 : vector<2x128xi32>
    %27 = vector.extract_strided_slice %1 {offsets = [2, 0, 0], sizes = [1, 2, 128], strides = [1, 1, 1]} : vector<4x2x128xf32> to vector<1x2x128xf32>
    %28 = vector.shape_cast %27 : vector<1x2x128xf32> to vector<2x128xf32>
    %cst_9 = arith.constant 0.000000e+00 : f32
    %29 = vector.broadcast %cst_9 : f32 to vector<2x128xf32>
    %30 = arith.select %26, %28, %29 : vector<2x128xi1>, vector<2x128xf32>
    %31 = arith.addf %24, %30 : vector<2x128xf32>
    %c3_i32 = arith.constant 3 : i32
    %32 = vector.broadcast %c3_i32 : i32 to vector<2x128xi32>
    %33 = arith.cmpi eq, %3, %32 : vector<2x128xi32>
    %34 = vector.extract_strided_slice %1 {offsets = [3, 0, 0], sizes = [1, 2, 128], strides = [1, 1, 1]} : vector<4x2x128xf32> to vector<1x2x128xf32>
    %35 = vector.shape_cast %34 : vector<1x2x128xf32> to vector<2x128xf32>
    %cst_10 = arith.constant 0.000000e+00 : f32
    %36 = vector.broadcast %cst_10 : f32 to vector<2x128xf32>
    %37 = arith.select %33, %35, %36 : vector<2x128xi1>, vector<2x128xf32>
    %38 = arith.addf %31, %37 : vector<2x128xf32>
    %39 = arith.subf %11, %38 : vector<2x128xf32>
    %cst_11 = arith.constant dense<0.000000e+00> : vector<128xf32>
    %40 = vector.multi_reduction <add>, %39, %cst_11 [0] : vector<2x128xf32> to vector<128xf32>
    %41 = vector.shape_cast %40 : vector<128xf32> to vector<1x128xf32>
    %c0_12 = arith.constant 0 : index
    %c0_13 = arith.constant 0 : index
    %c0_14 = arith.constant 0 : index
    %c0_15 = arith.constant 0 : index
    %42 = vector.load %arg4[%c0_12, %c0_13, %c0_14, %c0_15] : memref<1x1x1x128xf32, #tpu.memory_space<vmem>>, vector<1x1x1x128xf32>
    %43 = vector.shape_cast %42 : vector<1x1x1x128xf32> to vector<1x128xf32>
    %44 = vector.shape_cast %41 : vector<1x128xf32> to vector<1x1x1x128xf32>
    tpu.vector_store %arg4[%c0_12, %c0_13, %c0_14, %c0_15], %44 {strides = array<i32>} : memref<1x1x1x128xf32, #tpu.memory_space<vmem>>, vector<1x1x1x128xf32>,
    return
  }
  func.func @transform_0(%arg0: i32, %arg1: i32) -> (i32, i32, i32, i32) {
    %c0_i32 = arith.constant 0 : i32
    %c0_i32_0 = arith.constant 0 : i32
    %c0_i32_1 = arith.constant 0 : i32
    return %arg0, %c0_i32, %arg1, %c0_i32_0 : i32, i32, i32, i32
  }
  func.func @transform_1(%arg0: i32, %arg1: i32) -> (i32, i32, i32) {
    %c0_i32 = arith.constant 0 : i32
    %c0_i32_0 = arith.constant 0 : i32
    return %arg0, %arg1, %c0_i32 : i32, i32, i32
  }
  func.func @transform_2(%arg0: i32, %arg1: i32) -> (i32, i32, i32, i32) {
    %c0_i32 = arith.constant 0 : i32
    %c0_i32_0 = arith.constant 0 : i32
    %c0_i32_1 = arith.constant 0 : i32
    return %arg0, %arg1, %c0_i32, %c0_i32_0 : i32, i32, i32, i32
  }
}

</mosaic_0001>

<bundles_post_ra>
// kernel: tpu_custom_call.1
= control target key start
LH: loop header
LB: loop body
LE: loop exit
PB: predicated region body
PF: predicated region fallthrough
CT: control target
= control target key end

     0   :  { %7 = vsyncpa [#allocation3], 0  ;;  %s879_s0 = inlined_call_operand.hbm [shape: f32[2,4,2,128], index: 0, kind: input, shape index: {}]   ;;  %s880_s1 = inlined_call_operand.hbm [shape: s32[2,2,128], index: 1, kind: input, shape index: {}]   ;;  %s881_s2 = inlined_call_operand.hbm [shape: f32[2,1,1,128], index: 2, kind: output, shape index: {}]  }
   0x1   :  { %9 = vsyncpa [#allocation3 + $0x1], 0 }
   0x2   :  { %10 = vsyncpa [#allocation6], 0 }
   0x3   :  { %12 = vsyncpa [#allocation6 + $0x1], 0 }
   0x4   :  { %13 = vsyncpa [#allocation4], 0 }
   0x5   :  { %15 = vsyncpa [#allocation4 + $0x1], 0  ;;  %s651_s9 = smov 0   ;;  %s653_s10 = smov 0  }
   0x6   :  { %s655_s11 = smov 0   ;;  %s657_s12 = smov 0  }
   0x7   :  { %s659_s13 = smov 0   ;;  %s661_s14 = smov 0  }
   0x8 LB: > { %s388_s15 = sadd.s32 4294967295, %s629_s14   ;;  %s389_s16 = sadd.s32 4294967294, %s629_s14   ;;  %s629_s14 = sphi %s661_s14, %s21_s14   ;;  %s625_s13 = sphi %s659_s13, %s900_s13   ;;  %s621_s12 = sphi %s657_s12, %s899_s12   ;;  %s617_s11 = sphi %s655_s11, %s898_s11   ;;  %s613_s10 = sphi %s653_s10, %s897_s10   ;;  %s609_s9 = sphi %s651_s9, %s896_s9  }
   0x9   : > { %s33_s17 = sadd.s32 1, %s625_s13  ;;  %s42_s18 = sadd.s32 1, %s617_s11 }
   0xa   : > { %p35_p0 = scmp.ge.s32.totalorder %s33_s17, 2  ;;  %p49_p1 = scmp.ne.s32.totalorder %s617_s11, %s613_s10 }
   0xb   : > { %p50_p2 = scmp.eq.s32.totalorder %s629_s14, 0  ;;  %p55_p3 = scmp.ne.s32.totalorder %s613_s10, %s609_s9 }
   0xc   : > { %s902_s17 = smov (%p35_p0, %s33_s17), 0  ;;  %p56_p5 = scmp.eq.s32.totalorder %s388_s15, 0 }
   0xd   : > { %p692_p4 = por %p50_p2, %p49_p1  ;;  %s37_s20 = ssub.s32 %s625_s13, %s902_s17 }
   0xe   : > { %p109_p6 = scmp.eq.s32.totalorder %s388_s15, 1  ;;  %p40_p7 = scmp.eq.s32.totalorder %s37_s20, 0 }
   0xf   : > { %p698_p8 = por %p56_p5, %p55_p3  ;;  %p115_p10 = scmp.eq.s32.totalorder %s389_s16, 1 }
  0x10   : > { %p702_p9 = por %p109_p6, %p49_p1  ;;  %p421_p13 = scmp.lt.s32.totalorder %s629_s14, 2 }
  0x11   : > { %s885_s21 = scalar_select %p698_p8, 1, 0 }
  0x12   : > { %s886_s22 = scalar_select %p702_p9, 1, 0 }
  0x13   : > { %s707_s23 = scalar_select %p40_p7, %s617_s11, %s42_s18  }
  0x14   : > { %p709_p11 = por %p115_p10, %p55_p3  ;;  %s716_s25 = sand.u32 1, %s617_s11  }
  0x15   : > { %s392_s26 = sshll.u32 %s716_s25, 3  ;;  %s403_s27 = sshll.u32 %s625_s13, 7 }
  0x16   : > { %s887_s24 = scalar_select %p709_p11, 1, 0 }
  0x17   : > { %s723_s30 = scalar_lea.hbm %s879_s0, %s403_s27  ;;  %s139_s3 = scalar_lea.vmem [#allocation2], %s392_s26 }
  0x18   : > { %s147_s4 = sshll.u32 %s139_s3, 4  ;;  %p729_p0 = pnand %p421_p13, %p692_p4  ;;  %s725_s4 = int_to_ptr.vmem [resolvable:$true] %s147_s4 }
  0x19   : > { %s136_s6 = scalar_lea.sflag [#allocation3], %s716_s25  ;;  %s483_s7 = scalar_lea.hbm %s723_s30, 128 }
  0x1a   : > { %p484_p2 = scmp.ne.s32.totalorder %s723_s30, %s483_s7  ;;  %p485_p3 = pneg %p729_p0 }
  0x1b   : > { %s488_s16 = scalar_lea.hbm %s879_s0, 256  ;;  %p489_p4 = scmp.lt.u32.totalorder %s723_s30, %s879_s0 }
  0x1c   : > { %p486_p5 = pnand %p485_p3, %p484_p2  ;;  %p490_p7 = scmp.lt.u32.totalorder %s488_s16, %s483_s7 }
  0x1d   : > { %p492_p13 = scmp.lt.u32.totalorder %s483_s7, %s723_s30 }
  0x1e   : > { %p487_p6 = pneg %p486_p5  ;;  %p491_p10 = por %p490_p7, %p489_p4 }
  0x20   : > { %p493_p12 = por %p492_p13, %p491_p10 }
  0x22   : > { %p494_p1 = pnand %p493_p12, %p487_p6 }
  0x24   : > { %497 = shalt.err (!%p494_p1)
}
  0x25   : > { %s498_s20 = scalar_lea.vmem %s725_s4, 128  ;;  %s631_s26 = smov [#allocation2]  }
  0x26   : > { %p499_p2 = scmp.ne.s32.totalorder %s725_s4, %s498_s20  ;;  %s503_s27 = sshll.u32 %s631_s26, 4  ;;  %s504_s27 = int_to_ptr.vmem [resolvable:$false] %s503_s27 }
  0x27   : > { %s505_s28 = scalar_lea.vmem %s504_s27, 256  ;;  %p506_p9 = scmp.lt.s32.totalorder %s725_s4, %s504_s27 }
  0x28   : > { %p501_p5 = pnand %p499_p2, %p485_p3  ;;  %p507_p4 = scmp.lt.s32.totalorder %s505_s28, %s498_s20 }
  0x2a   : > { %p502_p11 = pneg %p501_p5  ;;  %p508_p7 = por %p507_p4, %p506_p9 }
  0x2c   : > { %p509_p10 = pnand %p508_p7, %p502_p11 }
  0x2e   : > { %512 = shalt.err (!%p509_p10)
}
  0x2f   : > { %s632_s29 = smov 32   ;;  %s633_s3 = smov 2  }
  0x30   : > { %413 = dma.hbm_to_vmem [thread:$0]  (!%p729_p0), %s723_s30, 128, %s725_s4, %s136_s6, %s632_s29, %s632_s29, %s633_s3  }
  0x31   : > { %p174_p12 = scmp.lt.s32.totalorder %s629_s14, 3  ;;  %s395_s7 = sshll.u32 %s716_s25, 1 }
  0x32   : > { %s396_s8 = sshll.u32 %s625_s13, 5  ;;  %p889_p9 = scmp.ge.s32.totalorder %s629_s14, 1 }
  0x33   : > { %s774_s19 = scalar_lea.hbm %s880_s1, %s396_s8  ;;  %s161_s20 = scalar_lea.vmem [#allocation5], %s395_s7 }
  0x34   : > { %p767_p11 = pnand %p889_p9, %p174_p12  ;;  %s169_s26 = sshll.u32 %s161_s20, 4  ;;  %s170_s26 = int_to_ptr.vmem [resolvable:$true] %s169_s26 }
  0x35   : > { %s158_s30 = scalar_lea.sflag [#allocation6], %s716_s25  ;;  %s513_s4 = scalar_lea.hbm %s774_s19, 32 }
  0x36   : > { %s890_s15 = scalar_select %p767_p11, 1, 0 }
  0x37   : > { %p514_p1 = scmp.ne.s32.totalorder %s774_s19, %s513_s4  ;;  %s518_s28 = scalar_lea.hbm %s880_s1, 64 }
  0x38   : > { %p519_p2 = scmp.lt.u32.totalorder %s774_s19, %s880_s1  ;;  %p520_p5 = scmp.lt.u32.totalorder %s518_s28, %s513_s4 }
  0x39   : > { %p516_p6 = pnand %p514_p1, %p485_p3  ;;  %p522_p7 = scmp.lt.u32.totalorder %s513_s4, %s774_s19 }
  0x3a   : > { %p521_p4 = por %p520_p5, %p519_p2 }
  0x3b   : > { %p517_p13 = pneg %p516_p6 }
  0x3c   : > { %p523_p10 = por %p522_p7, %p521_p4 }
  0x3e   : > { %p524_p12 = pnand %p523_p10, %p517_p13 }
  0x40   : > { %527 = shalt.err (!%p524_p12)
}
  0x41   : > { %s528_s25 = scalar_lea.vmem %s170_s26, 32  ;;  %s634_s7 = smov [#allocation5]  }
  0x42   : > { %p529_p9 = scmp.ne.s32.totalorder %s170_s26, %s528_s25  ;;  %s533_s8 = sshll.u32 %s634_s7, 4  ;;  %s534_s8 = int_to_ptr.vmem [resolvable:$false] %s533_s8 }
  0x43   : > { %s535_s16 = scalar_lea.vmem %s534_s8, 64  ;;  %p536_p8 = scmp.lt.s32.totalorder %s170_s26, %s534_s8 }
  0x44   : > { %p531_p1 = pnand %p529_p9, %p485_p3  ;;  %p537_p11 = scmp.lt.s32.totalorder %s535_s16, %s528_s25 }
  0x46   : > { %p532_p6 = pneg %p531_p1  ;;  %p538_p2 = por %p537_p11, %p536_p8 }
  0x48   : > { %p539_p5 = pnand %p538_p2, %p532_p6 }
  0x4a   : > { %542 = shalt.err (!%p539_p5)
}
  0x4b   : > { %416 = dma.hbm_to_vmem [thread:$0]  (!%p729_p0), %s774_s19, 32, %s170_s26, %s158_s30  }
  0x4c   : > { %p891_p13 = scmp.ne.s32.totalorder %s890_s15, 0 }
  0x4d   : > { %s799_s18 = sand.u32 (!%p891_p13), 1, %s613_s10   ;;  %p892_p3 = scmp.ne.s32.totalorder (!%p891_p13), %s885_s21, 0 }
  0x4e   : > { %178 = sbr.rel (%p891_p13) target bundleno = 163 (0xa3), region = 28  ;;  %s398_s20 = sshll.u32 (!%p891_p13), %s799_s18, 3 }
  0x4f   : > { %s181_s4 = scalar_lea.sflag (!%p891_p13), [#allocation3], %s799_s18  ;;  %s184_s6 = scalar_lea.vmem (!%p891_p13), [#allocation2], %s398_s20 }
  0x55   : > { %596 = dma.done.wait (%p892_p3), %s181_s4, 128  }
  0x56   : > { %598 = vsyncadd (%p892_p3), %s181_s4, 4294967168  ;;  %s399_s5 = sshll.u32 %s799_s18, 1  ;;  %s190_s15 = scalar_lea.sflag [#allocation6], %s799_s18 }
  0x57   : > { %s809_s19 = scalar_lea.vmem [#allocation5], %s399_s5 }
  0x58   : > { %600 = dma.done.wait (%p892_p3), %s190_s15, 32  }
  0x59   : > { %602 = vsyncadd (%p892_p3), %s190_s15, 4294967264  ;;  %vm223_vm0 = vcmask 1041408   ;;  %v218_v0 = vld [vmem:[%s184_s6] sm:$0x3]  ;;  %v219_v1 = vld [vmem:[%s184_s6 + $0x2] sm:$0x3] }
  0x5a   : > { %v220_v2 = vld [vmem:[%s184_s6 + $0x4] sm:$0x3]  ;;  %v221_v3 = vld [vmem:[%s184_s6 + $0x6] sm:$0x3]  ;;  %v224_v4 = vsel %vm223_vm0, %v218_v0, -inf  ;;  %v225_v5 = vsel %vm223_vm0, %v219_v1, -inf }
  0x5b   : > { %v226_v6 = vsel %vm223_vm0, %v220_v2, -inf  ;;  %v227_v7 = vsel %vm223_vm0, %v221_v3, -inf  ;;  %v228_v8 = vmax.f32 %v224_v4, %v225_v5  ;;  %v222_v25 = vld [vmem:[%s809_s19] sm:$0x3]  ;;  %s217_s21 = scalar_lea.vmem [#allocation7], %s799_s18  ;;  %s400_s30 = sshll.u32 %s621_s12, 4 }
  0x5c   : > { %v229_v9 = vmax.f32 %v226_v6, %v227_v7  ;;  %vm253_vm1 = vcmp.eq.s32.totalorder %v222_v25, 0  ;;  %vm255_vm2 = vcmp.eq.s32.totalorder %v222_v25, 1  ;;  %vm258_vm3 = vcmp.eq.s32.totalorder %v222_v25, 2  ;;  %s287_s26 = sshll.u32 %s217_s21, 4  ;;  %s832_s29 = scalar_lea.hbm %s881_s2, %s400_s30  ;;  %s827_s26 = int_to_ptr.vmem [resolvable:$true] %s287_s26 }
  0x5d   : > { %v254_v31 = vsel %vm253_vm1, %v218_v0, 0.0  ;;  %v256_v32 = vsel %vm255_vm2, %v219_v1, 0.0  ;;  %v259_v34 = vsel %vm258_vm3, %v220_v2, 0.0  ;;  %vm261_vm4 = vcmp.eq.s32.totalorder %v222_v25, 3  ;;  %s274_s3 = scalar_lea.sflag [#allocation4], %s799_s18  ;;  %s543_s25 = scalar_lea.vmem %s827_s26, 16 }
  0x5e   : > { %v230_v10 = vmax.f32 %v228_v8, %v229_v9  ;;  %v257_v33 = vadd.f32 %v256_v32, %v254_v31  ;;  %v262_v36 = vsel %vm261_vm4, %v221_v3, 0.0  ;;  %p544_p8 = scmp.ne.s32.totalorder %s827_s26, %s543_s25  ;;  %p893_p0 = scmp.ne.s32.totalorder %s886_s22, 0 }
  0x5f   : > { %s635_s12 = smov [#allocation7]  }
  0x60   : > { %v231_v11 = vsub.f32 %v218_v0, %v230_v10  ;;  %v232_v12 = vsub.f32 %v219_v1, %v230_v10  ;;  %v233_v13 = vsub.f32 %v220_v2, %v230_v10  ;;  %v234_v14 = vsub.f32 %v221_v3, %v230_v10  ;;  %p545_p11 = pnand %p544_p8, %p893_p0  ;;  %s547_s7 = sshll.u32 %s635_s12, 4  ;;  %s548_s7 = int_to_ptr.vmem [resolvable:$false] %s547_s7 }
  0x61   : > { %v260_v35 = vadd.f32 %v259_v34, %v257_v33  ;;  %s549_s8 = scalar_lea.vmem %s548_s7, 32  ;;  %p550_p7 = scmp.lt.s32.totalorder %s827_s26, %s548_s7 }
  0x62   : > { %v235_v15 = vmul.f32 1.442695, %v231_v11  ;;  %v237_v16 = vmul.f32 1.442695, %v232_v12  ;;  %v239_v17 = vmul.f32 1.442695, %v233_v13  ;;  %p546_p4 = pneg %p545_p11  ;;  %p551_p10 = scmp.lt.s32.totalorder %s549_s8, %s543_s25 }
  0x63   : > { %v241_v18 = vmul.f32 1.442695, %v234_v14  ;;  %v263_v39 = vadd.f32 %v262_v36, %v260_v35 }
  0x64   : > { %473 = vpow2.f32 %v235_v15  ;;  %p552_p12 = por %p551_p10, %p550_p7 }
  0x65   : > { %475 = vpow2.f32 %v237_v16 }
  0x66   : > { %477 = vpow2.f32 %v239_v17  ;;  %p553_p9 = pnand %p552_p12, %p546_p4 }
  0x67   : > { %479 = vpow2.f32 %v241_v18 }
  0x6e   : > { %v474_v19 = vpop.eup %473 }
  0x6f   : > { %v476_v20 = vpop.eup %475  ;;  %v243_v21 = vsel %vm223_vm0, %v474_v19, 0.0 }
  0x70   : > { %v478_v22 = vpop.eup %477  ;;  %v244_v23 = vsel %vm223_vm0, %v476_v20, 0.0 }
  0x71   : > { %v480_v24 = vpop.eup %479  ;;  %v245_v26 = vadd.f32 %v244_v23, %v243_v21  ;;  %v246_v27 = vsel %vm223_vm0, %v478_v22, 0.0 }
  0x72   : > { %v248_v28 = vsel %vm223_vm0, %v480_v24, 0.0 }
  0x73   : > { %v247_v29 = vadd.f32 %v246_v27, %v245_v26 }
  0x75   : > { %v249_v30 = vadd.f32 %v248_v28, %v247_v29 }
  0x77   : > { %481 = vlog2.f32 %v249_v30 }
  0x81   : > { %v482_v37 = vpop.eup %481 }
  0x82   : > { %v251_v38 = vmul.f32 0.6931472, %v482_v37 }
  0x84   : > { %v252_v40 = vadd.f32 %v251_v38, %v230_v10 }
  0x86   : > { %v264_v41 = vsub.f32 %v252_v40, %v263_v39 }
  0x88   : > { %v265_v42 = vsel %vm223_vm0, %v264_v41, 0.0 }
  0x89   : > { %v266_v43 = vrot.slane %v265_v42, 4 }
  0x8b   : > { %v267_v44 = vadd.f32 %v266_v43, %v265_v42 }
  0x8d   : > { %v268_v45 = vrot.slane %v267_v44, 2 }
  0x8f   : > { %v269_v46 = vadd.f32 %v268_v45, %v267_v44 }
  0x91   : > { %v270_v47 = vrot.slane %v269_v46, 1 }
  0x93   : > { %v271_v48 = vadd.f32 %v270_v47, %v269_v46 }
  0x95   : > { %272 = vst [vmem:[%s217_s21] sm:$0x1] %v271_v48 }
  0x96   : > { %556 = shalt.err (!%p553_p9)
}
  0x97   : > { %s557_s16 = scalar_lea.hbm %s832_s29, 16  ;;  %s561_s4 = scalar_lea.hbm %s881_s2, 32 }
  0x98   : > { %p558_p1 = scmp.ne.s32.totalorder %s832_s29, %s557_s16  ;;  %p562_p5 = scmp.lt.u32.totalorder %s832_s29, %s881_s2 }
  0x99   : > { %p563_p13 = scmp.lt.u32.totalorder %s561_s4, %s557_s16  ;;  %p565_p8 = scmp.lt.u32.totalorder %s557_s16, %s832_s29 }
  0x9a   : > { %p559_p6 = pnand %p558_p1, %p893_p0 }
  0x9b   : > { %p564_p3 = por %p563_p13, %p562_p5 }
  0x9c   : > { %p560_p2 = pneg %p559_p6 }
  0x9d   : > { %p566_p11 = por %p565_p8, %p564_p3 }
  0x9f   : > { %p567_p4 = pnand %p566_p11, %p560_p2 }
  0xa1   : > { %570 = shalt.err (!%p567_p4)
}
  0xa2   : > { %408 = dma.vmem_to_hbm [thread:$0]  (%p893_p0), %s827_s26, 16, %s832_s29, %s274_s3  }
  0xa3 PF: > { %s299_s15 = sand.u32 1, %s609_s9   ;;  %p894_p7 = scmp.ne.s32.totalorder %s887_s24, 0 }
  0xa4   : > { %p895_p10 = scmp.ge.s32.totalorder %s629_s14, 2  ;;  %s300_s19 = scalar_lea.sflag [#allocation4], %s299_s15 }
  0xa6   : > { %p418_p12 = pnand %p895_p10, %p894_p7 }
  0xa8   : > { %604 = dma.done.wait (!%p418_p12), %s300_s19, 16  }
  0xa9   : > { %606 = vsyncadd (!%p418_p12), %s300_s19, 4294967280  ;;  %s21_s14 = sadd.s32 1, %s629_s14   ;;  %s896_s9 = smov %s613_s10 }
  0xaa   : > { %p18_p9 = scmp.ge.s32.totalorder %s21_s14, 4   ;;  %s897_s10 = smov %s617_s11 }
  0xab   : > { %s898_s11 = smov %s707_s23  ;;  %s899_s12 = smov %s625_s13 }
  0xac   : > { %s900_s13 = smov %s902_s17  ;;  %20 = sbr.rel (!%p18_p9) target bundleno = 8 (0x8), region = 86 }
  0xb3   :  { %304 = vsyncpa [#allocation3], 1 }
  0xb4   :  { %306 = vsyncpa [#allocation3 + $0x1], 1 }
  0xb5   :  { %307 = vsyncpa [#allocation6], 1 }
  0xb6   :  { %309 = vsyncpa [#allocation6 + $0x1], 1 }
  0xb7   :  { %310 = vsyncpa [#allocation4], 1 }
  0xb8   :  { %312 = vsyncpa [#allocation4 + $0x1], 1 }

</bundles_post_ra>
